<compile_context>
chip_gen: v7x
topology: tpu7x:2x2x1
jax: 0.10.0
libtpu: 0.0.40
codegen_flags: <defaults>
</compile_context>

<pallas_src>
import functools
import math

import jax
import jax.numpy as jnp
from jax.experimental import pallas as pl
from jax.experimental.pallas import tpu as pltpu


# ---------------------------------------------------------------------------
# In-kernel math helpers (only guaranteed-lowerable primitives: mul/add/exp/rsqrt)
# ---------------------------------------------------------------------------

def _erf(x):
    # Abramowitz & Stegun 7.1.26 rational approximation, |err| <= 1.5e-7.
    a1, a2, a3, a4, a5 = 0.254829592, -0.284496736, 1.421413741, -1.453152027, 1.061405429
    pc = 0.3275911
    sgn = jnp.where(x >= 0.0, 1.0, -1.0)
    ax = jnp.abs(x)
    t = 1.0 / (1.0 + pc * ax)
    poly = ((((a5 * t + a4) * t + a3) * t + a2) * t + a1) * t
    return sgn * (1.0 - poly * jnp.exp(-ax * ax))


def _gelu_exact(x):
    # PyTorch F.gelu default (approximate='none'): 0.5*x*(1+erf(x/sqrt(2))).
    return 0.5 * x * (1.0 + _erf(x * 0.7071067811865476))


def _layernorm(x, g, b, eps):
    mu = jnp.mean(x, axis=-1, keepdims=True)
    xc = x - mu
    var = jnp.mean(xc * xc, axis=-1, keepdims=True)
    return xc * jax.lax.rsqrt(var + eps) * g + b


# ---------------------------------------------------------------------------
# Fused encoder-layer kernel (one batch row per grid step)
# ---------------------------------------------------------------------------

def _encoder_layer_kernel(x_ref, wqkv_ref, bqkv_ref, wo_ref, bo_ref,
                          g1_ref, be1_ref, w1_ref, bf1_ref,
                          w2_ref, bf2_ref, g2_ref, be2_ref,
                          o_ref, *, num_heads, eps):
    x = x_ref[0]                                   # (S, D) block for this batch row
    S, D = x.shape
    dh = D // num_heads
    scale = 1.0 / math.sqrt(dh)

    # --- self-attention ----------------------------------------------------
    qkv = jnp.dot(x, wqkv_ref[...], preferred_element_type=jnp.float32) + bqkv_ref[...]
    q = qkv[:, :D]
    k = qkv[:, D:2 * D]
    v = qkv[:, 2 * D:]

    head_outs = []
    for h in range(num_heads):                     # static, compile-time loop
        lo, hi = h * dh, (h + 1) * dh
        qh, kh, vh = q[:, lo:hi], k[:, lo:hi], v[:, lo:hi]
        s = jnp.dot(qh, kh.T, preferred_element_type=jnp.float32) * scale
        s = s - jnp.max(s, axis=-1, keepdims=True)
        p = jnp.exp(s)
        p = p / jnp.sum(p, axis=-1, keepdims=True)
        head_outs.append(jnp.dot(p, vh, preferred_element_type=jnp.float32))
    attn = jnp.concatenate(head_outs, axis=-1)                                 # (S, D)
    attn = jnp.dot(attn, wo_ref[...], preferred_element_type=jnp.float32) + bo_ref[...]

    x = _layernorm(x + attn, g1_ref[...], be1_ref[...], eps)   # post-norm 1

    # --- feed-forward --------------------------------------------------------
    h1 = jnp.dot(x, w1_ref[...], preferred_element_type=jnp.float32) + bf1_ref[...]
    h1 = _gelu_exact(h1)
    ff = jnp.dot(h1, w2_ref[...], preferred_element_type=jnp.float32) + bf2_ref[...]

    x = _layernorm(x + ff, g2_ref[...], be2_ref[...], eps)     # post-norm 2
    o_ref[0] = x.astype(o_ref.dtype)


def _encoder_layer(x, lw, *, num_heads, eps=1e-5):
    B, S, D = x.shape
    F = lw["w1"].shape[1]

    def wspec(shape):
        nd = len(shape)
        return pl.BlockSpec(shape, lambda b, _nd=nd: (0,) * _nd)  # constant -> resident

    kernel = functools.partial(_encoder_layer_kernel, num_heads=num_heads, eps=eps)
    return pl.pallas_call(
        kernel,
        out_shape=jax.ShapeDtypeStruct((B, S, D), jnp.float32),
        grid=(B,),
        in_specs=[
            pl.BlockSpec((1, S, D), lambda b: (b, 0, 0)),   # activations: 1 row / step
            wspec((D, 3 * D)), wspec((1, 3 * D)),           # QKV projection (in, out)
            wspec((D, D)), wspec((1, D)),                   # output projection
            wspec((1, D)), wspec((1, D)),                   # norm1 gamma / beta
            wspec((D, F)), wspec((1, F)),                   # linear1
            wspec((F, D)), wspec((1, D)),                   # linear2
            wspec((1, D)), wspec((1, D)),                   # norm2 gamma / beta
        ],
        out_specs=pl.BlockSpec((1, S, D), lambda b: (b, 0, 0)),
        compiler_params=pltpu.CompilerParams(
            dimension_semantics=("parallel",),              # megacore-shardable batch
        ),
    )(x, lw["wqkv"], lw["bqkv"], lw["wo"], lw["bo"],
      lw["g1"], lw["be1"], lw["w1"], lw["bf1"],
      lw["w2"], lw["bf2"], lw["g2"], lw["be2"])


# ---------------------------------------------------------------------------
# Model wrapper: cls token prepend + stack of fused layer kernels
# ---------------------------------------------------------------------------

def transformer_encoder_forward(x, params, *, num_heads):
    B = x.shape[0]
    D = params["cls_token"].shape[-1]
    cls = jnp.broadcast_to(params["cls_token"], (B, 1, D))
    h = jnp.concatenate([cls, x.astype(jnp.float32)], axis=1)   # (B, S+1, D)
    for lw in params["layers"]:
        h = _encoder_layer(h, lw, num_heads=num_heads)
    # TransformerEncoder(norm=None): no final LayerNorm.
    # TODO(synk): return_attn=True path (averaged attention weights output) not implemented.
    return h


def init_params(key, d_model, num_layers, num_heads, mlp_ratio):
    """Deterministic params; all linear weights stored pre-transposed to (in, out)."""
    assert d_model % num_heads == 0
    d_ff = mlp_ratio * d_model
    keys = jax.random.split(key, num_layers + 1)
    # nn.Parameter(torch.rand(1, 1, d_model)) -> uniform [0, 1)
    cls_token = jax.random.uniform(keys[0], (1, 1, d_model), jnp.float32)

    def unif(k, shape, fan_in):
        bound = 1.0 / math.sqrt(fan_in)
        return jax.random.uniform(k, shape, jnp.float32, -bound, bound)

    layers = []
    for i in range(num_layers):
        lk = jax.random.split(keys[i + 1], 6)
        layers.append(dict(
            wqkv=unif(lk[0], (d_model, 3 * d_model), d_model),
            bqkv=jnp.zeros((1, 3 * d_model), jnp.float32),
            wo=unif(lk[1], (d_model, d_model), d_model),
            bo=jnp.zeros((1, d_model), jnp.float32),
            g1=jnp.ones((1, d_model), jnp.float32),
            be1=jnp.zeros((1, d_model), jnp.float32),
            w1=unif(lk[2], (d_model, d_ff), d_model),
            bf1=unif(lk[3], (1, d_ff), d_model),
            w2=unif(lk[4], (d_ff, d_model), d_ff),
            bf2=unif(lk[5], (1, d_model), d_ff),
            g2=jnp.ones((1, d_model), jnp.float32),
            be2=jnp.zeros((1, d_model), jnp.float32),
        ))
    return {"cls_token": cls_token, "layers": layers}


# ---------------------------------------------------------------------------
# Pure-JAX reference (mirrors the PyTorch forward) for in-script validation
# ---------------------------------------------------------------------------

def _ref_layernorm(x, g, b, eps=1e-5):
    mu = jnp.mean(x, axis=-1, keepdims=True)
    var = jnp.mean((x - mu) ** 2, axis=-1, keepdims=True)
    return (x - mu) * jax.lax.rsqrt(var + eps) * g + b


def _reference_forward(x, params, *, num_heads, eps=1e-5):
    B = x.shape[0]
    D = params["cls_token"].shape[-1]
    dh = D // num_heads
    scale = 1.0 / math.sqrt(dh)
    cls = jnp.broadcast_to(params["cls_token"], (B, 1, D))
    h = jnp.concatenate([cls, x.astype(jnp.float32)], axis=1)
    for lw in params["layers"]:
        B_, S, _ = h.shape
        qkv = h @ lw["wqkv"] + lw["bqkv"]
        q = qkv[..., :D].reshape(B_, S, num_heads, dh)
        k = qkv[..., D:2 * D].reshape(B_, S, num_heads, dh)
        v = qkv[..., 2 * D:].reshape(B_, S, num_heads, dh)
        s = jnp.einsum("bqhd,bkhd->bhqk", q, k) * scale
        p = jax.nn.softmax(s, axis=-1)
        o = jnp.einsum("bhqk,bkhd->bqhd", p, v).reshape(B_, S, D)
        o = o @ lw["wo"] + lw["bo"]
        h = _ref_layernorm(h + o, lw["g1"], lw["be1"], eps)
        ff = jax.nn.gelu(h @ lw["w1"] + lw["bf1"], approximate=False) @ lw["w2"] + lw["bf2"]
        h = _ref_layernorm(h + ff, lw["g2"], lw["be2"], eps)
    return h


if __name__ == "__main__":
    key = jax.random.PRNGKey(0)
    k_x, k_p = jax.random.split(key)

    # Small shapes consistent with TransformerEncoderModel: (batch, seq, d_model).
    batch, seq, d_model = 2, 8, 32
    num_layers, num_heads, mlp_ratio = 2, 2, 4

    x = jax.random.normal(k_x, (batch, seq, d_model), jnp.float32)
    params = init_params(k_p, d_model, num_layers, num_heads, mlp_ratio)

    out = transformer_encoder_forward(x, params, num_heads=num_heads)
    jax.block_until_ready(out)

    ref = _reference_forward(x, params, num_heads=num_heads)
    assert out.shape == (batch, seq + 1, d_model)
    assert jnp.allclose(out, ref, atol=2e-3, rtol=2e-3), (
        "mismatch vs reference: max abs err "
        f"{float(jnp.max(jnp.abs(out - ref)))}")

    print("KERNEL_OK")
</pallas_src>

<mosaic_0001>
module attributes {stable_mosaic.version = 11 : i64} {
  func.func @_encoder_layer_kernel(%arg0: i32, %arg1: memref<1x9x32xf32, #tpu.memory_space<vmem>>, %arg2: memref<32x96xf32, #tpu.memory_space<vmem>>, %arg3: memref<1x96xf32, #tpu.memory_space<vmem>>, %arg4: memref<32x32xf32, #tpu.memory_space<vmem>>, %arg5: memref<1x32xf32, #tpu.memory_space<vmem>>, %arg6: memref<1x32xf32, #tpu.memory_space<vmem>>, %arg7: memref<1x32xf32, #tpu.memory_space<vmem>>, %arg8: memref<32x128xf32, #tpu.memory_space<vmem>>, %arg9: memref<1x128xf32, #tpu.memory_space<vmem>>, %arg10: memref<128x32xf32, #tpu.memory_space<vmem>>, %arg11: memref<1x32xf32, #tpu.memory_space<vmem>>, %arg12: memref<1x32xf32, #tpu.memory_space<vmem>>, %arg13: memref<1x32xf32, #tpu.memory_space<vmem>>, %arg14: memref<1x9x32xf32, #tpu.memory_space<vmem>>) attributes {dimension_semantics = [#tpu.dimension_semantics<parallel>], iteration_bounds = array<i64: 2>, scalar_prefetch = 0 : i64, scratch_operands = 0 : i64, tpu.core_type = #tpu.core_type<tc>, window_params = [{transform_indices = @transform_0, window_bounds = array<i64: 1, 9, 32>}, {pipeline_mode = #tpu.pipeline_mode<synchronous>, transform_indices = @transform_1, window_bounds = array<i64: 32, 96>}, {pipeline_mode = #tpu.pipeline_mode<synchronous>, transform_indices = @transform_2, window_bounds = array<i64: 1, 96>}, {pipeline_mode = #tpu.pipeline_mode<synchronous>, transform_indices = @transform_3, window_bounds = array<i64: 32, 32>}, {pipeline_mode = #tpu.pipeline_mode<synchronous>, transform_indices = @transform_4, window_bounds = array<i64: 1, 32>}, {pipeline_mode = #tpu.pipeline_mode<synchronous>, transform_indices = @transform_5, window_bounds = array<i64: 1, 32>}, {pipeline_mode = #tpu.pipeline_mode<synchronous>, transform_indices = @transform_6, window_bounds = array<i64: 1, 32>}, {pipeline_mode = #tpu.pipeline_mode<synchronous>, transform_indices = @transform_7, window_bounds = array<i64: 32, 128>}, {pipeline_mode = #tpu.pipeline_mode<synchronous>, transform_indices = @transform_8, window_bounds = array<i64: 1, 128>}, {pipeline_mode = #tpu.pipeline_mode<synchronous>, transform_indices = @transform_9, window_bounds = array<i64: 128, 32>}, {pipeline_mode = #tpu.pipeline_mode<synchronous>, transform_indices = @transform_10, window_bounds = array<i64: 1, 32>}, {pipeline_mode = #tpu.pipeline_mode<synchronous>, transform_indices = @transform_11, window_bounds = array<i64: 1, 32>}, {pipeline_mode = #tpu.pipeline_mode<synchronous>, transform_indices = @transform_12, window_bounds = array<i64: 1, 32>}, {transform_indices = @transform_13, window_bounds = array<i64: 1, 9, 32>}]} {
    %c0 = arith.constant 0 : index
    %c0_0 = arith.constant 0 : index
    %c0_1 = arith.constant 0 : index
    %0 = vector.load %arg1[%c0, %c0_0, %c0_1] : memref<1x9x32xf32, #tpu.memory_space<vmem>>, vector<1x9x32xf32>
    %1 = vector.shape_cast %0 : vector<1x9x32xf32> to vector<9x32xf32>
    %c0_2 = arith.constant 0 : index
    %c0_3 = arith.constant 0 : index
    %2 = vector.load %arg2[%c0_2, %c0_3] : memref<32x96xf32, #tpu.memory_space<vmem>>, vector<32x96xf32>
    %cst = arith.constant dense<0.000000e+00> : vector<9x96xf32>
    %3 = tpu.matmul %1, %2, %cst {dimension_numbers = #tpu.dot_dimension_numbers<[1], [0], [0], [1], [0, 0, 1, 1], [], []>} : vector<9x32xf32>, vector<32x96xf32>, vector<9x96xf32> -> vector<9x96xf32>
    %c0_4 = arith.constant 0 : index
    %c0_5 = arith.constant 0 : index
    %4 = vector.load %arg3[%c0_4, %c0_5] : memref<1x96xf32, #tpu.memory_space<vmem>>, vector<1x96xf32>
    %5 = vector.broadcast %4 : vector<1x96xf32> to vector<9x96xf32>
    %6 = arith.addf %3, %5 : vector<9x96xf32>
    %7 = vector.extract_strided_slice %6 {offsets = [0, 0], sizes = [9, 32], strides = [1, 1]} : vector<9x96xf32> to vector<9x32xf32>
    %8 = vector.extract_strided_slice %6 {offsets = [0, 32], sizes = [9, 32], strides = [1, 1]} : vector<9x96xf32> to vector<9x32xf32>
    %9 = vector.extract_strided_slice %6 {offsets = [0, 64], sizes = [9, 32], strides = [1, 1]} : vector<9x96xf32> to vector<9x32xf32>
    %10 = vector.extract_strided_slice %7 {offsets = [0, 0], sizes = [9, 16], strides = [1, 1]} : vector<9x32xf32> to vector<9x16xf32>
    %11 = vector.extract_strided_slice %8 {offsets = [0, 0], sizes = [9, 16], strides = [1, 1]} : vector<9x32xf32> to vector<9x16xf32>
    %12 = vector.extract_strided_slice %9 {offsets = [0, 0], sizes = [9, 16], strides = [1, 1]} : vector<9x32xf32> to vector<9x16xf32>
    %13 = tpu.transpose %11, [1, 0] : vector<9x16xf32> -> vector<16x9xf32>
    %cst_6 = arith.constant dense<0.000000e+00> : vector<9x9xf32>
    %14 = tpu.matmul %10, %13, %cst_6 {dimension_numbers = #tpu.dot_dimension_numbers<[1], [0], [0], [1], [0, 0, 1, 1], [], []>} : vector<9x16xf32>, vector<16x9xf32>, vector<9x9xf32> -> vector<9x9xf32>
    %cst_7 = arith.constant 2.500000e-01 : f32
    %15 = vector.broadcast %cst_7 : f32 to vector<9x9xf32>
    %16 = arith.mulf %14, %15 : vector<9x9xf32>
    %cst_8 = arith.constant dense<0xFF800000> : vector<9xf32>
    %17 = vector.multi_reduction <maximumf>, %16, %cst_8 [1] : vector<9x9xf32> to vector<9xf32>
    %18 = vector.shape_cast %17 : vector<9xf32> to vector<9x1xf32>
    %19 = vector.broadcast %18 : vector<9x1xf32> to vector<9x9xf32>
    %20 = arith.subf %16, %19 : vector<9x9xf32>
    %21 = math.exp %20 : vector<9x9xf32>
    %cst_9 = arith.constant dense<0.000000e+00> : vector<9xf32>
    %22 = vector.multi_reduction <add>, %21, %cst_9 [1] : vector<9x9xf32> to vector<9xf32>
    %23 = vector.shape_cast %22 : vector<9xf32> to vector<9x1xf32>
    %24 = vector.broadcast %23 : vector<9x1xf32> to vector<9x9xf32>
    %25 = arith.divf %21, %24 : vector<9x9xf32>
    %cst_10 = arith.constant dense<0.000000e+00> : vector<9x16xf32>
    %26 = tpu.matmul %25, %12, %cst_10 {dimension_numbers = #tpu.dot_dimension_numbers<[1], [0], [0], [1], [0, 0, 1, 1], [], []>} : vector<9x9xf32>, vector<9x16xf32>, vector<9x16xf32> -> vector<9x16xf32>
    %27 = vector.extract_strided_slice %7 {offsets = [0, 16], sizes = [9, 16], strides = [1, 1]} : vector<9x32xf32> to vector<9x16xf32>
    %28 = vector.extract_strided_slice %8 {offsets = [0, 16], sizes = [9, 16], strides = [1, 1]} : vector<9x32xf32> to vector<9x16xf32>
    %29 = vector.extract_strided_slice %9 {offsets = [0, 16], sizes = [9, 16], strides = [1, 1]} : vector<9x32xf32> to vector<9x16xf32>
    %30 = tpu.transpose %28, [1, 0] : vector<9x16xf32> -> vector<16x9xf32>
    %cst_11 = arith.constant dense<0.000000e+00> : vector<9x9xf32>
    %31 = tpu.matmul %27, %30, %cst_11 {dimension_numbers = #tpu.dot_dimension_numbers<[1], [0], [0], [1], [0, 0, 1, 1], [], []>} : vector<9x16xf32>, vector<16x9xf32>, vector<9x9xf32> -> vector<9x9xf32>
    %cst_12 = arith.constant 2.500000e-01 : f32
    %32 = vector.broadcast %cst_12 : f32 to vector<9x9xf32>
    %33 = arith.mulf %31, %32 : vector<9x9xf32>
    %cst_13 = arith.constant dense<0xFF800000> : vector<9xf32>
    %34 = vector.multi_reduction <maximumf>, %33, %cst_13 [1] : vector<9x9xf32> to vector<9xf32>
    %35 = vector.shape_cast %34 : vector<9xf32> to vector<9x1xf32>
    %36 = vector.broadcast %35 : vector<9x1xf32> to vector<9x9xf32>
    %37 = arith.subf %33, %36 : vector<9x9xf32>
    %38 = math.exp %37 : vector<9x9xf32>
    %cst_14 = arith.constant dense<0.000000e+00> : vector<9xf32>
    %39 = vector.multi_reduction <add>, %38, %cst_14 [1] : vector<9x9xf32> to vector<9xf32>
    %40 = vector.shape_cast %39 : vector<9xf32> to vector<9x1xf32>
    %41 = vector.broadcast %40 : vector<9x1xf32> to vector<9x9xf32>
    %42 = arith.divf %38, %41 : vector<9x9xf32>
    %cst_15 = arith.constant dense<0.000000e+00> : vector<9x16xf32>
    %43 = tpu.matmul %42, %29, %cst_15 {dimension_numbers = #tpu.dot_dimension_numbers<[1], [0], [0], [1], [0, 0, 1, 1], [], []>} : vector<9x9xf32>, vector<9x16xf32>, vector<9x16xf32> -> vector<9x16xf32>
    %44 = tpu.concatenate %26, %43 in 1 : vector<9x16xf32>, vector<9x16xf32> -> vector<9x32xf32>
    %c0_16 = arith.constant 0 : index
    %c0_17 = arith.constant 0 : index
    %45 = vector.load %arg4[%c0_16, %c0_17] : memref<32x32xf32, #tpu.memory_space<vmem>>, vector<32x32xf32>
    %cst_18 = arith.constant dense<0.000000e+00> : vector<9x32xf32>
    %46 = tpu.matmul %44, %45, %cst_18 {dimension_numbers = #tpu.dot_dimension_numbers<[1], [0], [0], [1], [0, 0, 1, 1], [], []>} : vector<9x32xf32>, vector<32x32xf32>, vector<9x32xf32> -> vector<9x32xf32>
    %c0_19 = arith.constant 0 : index
    %c0_20 = arith.constant 0 : index
    %47 = vector.load %arg5[%c0_19, %c0_20] : memref<1x32xf32, #tpu.memory_space<vmem>>, vector<1x32xf32>
    %48 = vector.broadcast %47 : vector<1x32xf32> to vector<9x32xf32>
    %49 = arith.addf %46, %48 : vector<9x32xf32>
    %50 = arith.addf %1, %49 : vector<9x32xf32>
    %c0_21 = arith.constant 0 : index
    %c0_22 = arith.constant 0 : index
    %51 = vector.load %arg6[%c0_21, %c0_22] : memref<1x32xf32, #tpu.memory_space<vmem>>, vector<1x32xf32>
    %c0_23 = arith.constant 0 : index
    %c0_24 = arith.constant 0 : index
    %52 = vector.load %arg7[%c0_23, %c0_24] : memref<1x32xf32, #tpu.memory_space<vmem>>, vector<1x32xf32>
    %cst_25 = arith.constant dense<0.000000e+00> : vector<9xf32>
    %53 = vector.multi_reduction <add>, %50, %cst_25 [1] : vector<9x32xf32> to vector<9xf32>
    %54 = vector.shape_cast %53 : vector<9xf32> to vector<9x1xf32>
    %cst_26 = arith.constant 3.200000e+01 : f32
    %55 = vector.broadcast %cst_26 : f32 to vector<9x1xf32>
    %56 = arith.divf %54, %55 : vector<9x1xf32>
    %57 = vector.broadcast %56 : vector<9x1xf32> to vector<9x32xf32>
    %58 = arith.subf %50, %57 : vector<9x32xf32>
    %59 = arith.mulf %58, %58 : vector<9x32xf32>
    %cst_27 = arith.constant dense<0.000000e+00> : vector<9xf32>
    %60 = vector.multi_reduction <add>, %59, %cst_27 [1] : vector<9x32xf32> to vector<9xf32>
    %61 = vector.shape_cast %60 : vector<9xf32> to vector<9x1xf32>
    %cst_28 = arith.constant 3.200000e+01 : f32
    %62 = vector.broadcast %cst_28 : f32 to vector<9x1xf32>
    %63 = arith.divf %61, %62 : vector<9x1xf32>
    %cst_29 = arith.constant 9.99999974E-6 : f32
    %64 = vector.broadcast %cst_29 : f32 to vector<9x1xf32>
    %65 = arith.addf %63, %64 : vector<9x1xf32>
    %66 = math.rsqrt %65 : vector<9x1xf32>
    %67 = vector.broadcast %66 : vector<9x1xf32> to vector<9x32xf32>
    %68 = arith.mulf %58, %67 : vector<9x32xf32>
    %69 = vector.broadcast %51 : vector<1x32xf32> to vector<9x32xf32>
    %70 = arith.mulf %68, %69 : vector<9x32xf32>
    %71 = vector.broadcast %52 : vector<1x32xf32> to vector<9x32xf32>
    %72 = arith.addf %70, %71 : vector<9x32xf32>
    %c0_30 = arith.constant 0 : index
    %c0_31 = arith.constant 0 : index
    %73 = vector.load %arg8[%c0_30, %c0_31] : memref<32x128xf32, #tpu.memory_space<vmem>>, vector<32x128xf32>
    %cst_32 = arith.constant dense<0.000000e+00> : vector<9x128xf32>
    %74 = tpu.matmul %72, %73, %cst_32 {dimension_numbers = #tpu.dot_dimension_numbers<[1], [0], [0], [1], [0, 0, 1, 1], [], []>} : vector<9x32xf32>, vector<32x128xf32>, vector<9x128xf32> -> vector<9x128xf32>
    %c0_33 = arith.constant 0 : index
    %c0_34 = arith.constant 0 : index
    %75 = vector.load %arg9[%c0_33, %c0_34] : memref<1x128xf32, #tpu.memory_space<vmem>>, vector<1x128xf32>
    %76 = vector.broadcast %75 : vector<1x128xf32> to vector<9x128xf32>
    %77 = arith.addf %74, %76 : vector<9x128xf32>
    %cst_35 = arith.constant 5.000000e-01 : f32
    %78 = vector.broadcast %cst_35 : f32 to vector<9x128xf32>
    %79 = arith.mulf %78, %77 : vector<9x128xf32>
    %cst_36 = arith.constant 0.707106769 : f32
    %80 = vector.broadcast %cst_36 : f32 to vector<9x128xf32>
    %81 = arith.mulf %77, %80 : vector<9x128xf32>
    %cst_37 = arith.constant 0.000000e+00 : f32
    %82 = vector.broadcast %cst_37 : f32 to vector<9x128xf32>
    %83 = arith.cmpf oge, %81, %82 : vector<9x128xf32>
    %cst_38 = arith.constant 1.000000e+00 : f32
    %cst_39 = arith.constant -1.000000e+00 : f32
    %84 = vector.broadcast %cst_38 : f32 to vector<9x128xf32>
    %85 = vector.broadcast %cst_39 : f32 to vector<9x128xf32>
    %86 = arith.select %83, %84, %85 : vector<9x128xi1>, vector<9x128xf32>
    %87 = math.absf %81 : vector<9x128xf32>
    %cst_40 = arith.constant 0.327591091 : f32
    %88 = vector.broadcast %cst_40 : f32 to vector<9x128xf32>
    %89 = arith.mulf %88, %87 : vector<9x128xf32>
    %cst_41 = arith.constant 1.000000e+00 : f32
    %90 = vector.broadcast %cst_41 : f32 to vector<9x128xf32>
    %91 = arith.addf %90, %89 : vector<9x128xf32>
    %cst_42 = arith.constant 1.000000e+00 : f32
    %92 = vector.broadcast %cst_42 : f32 to vector<9x128xf32>
    %93 = arith.divf %92, %91 : vector<9x128xf32>
    %cst_43 = arith.constant 1.06140542 : f32
    %94 = vector.broadcast %cst_43 : f32 to vector<9x128xf32>
    %95 = arith.mulf %94, %93 : vector<9x128xf32>
    %cst_44 = arith.constant -1.45315206 : f32
    %96 = vector.broadcast %cst_44 : f32 to vector<9x128xf32>
    %97 = arith.addf %95, %96 : vector<9x128xf32>
    %98 = arith.mulf %97, %93 : vector<9x128xf32>
    %cst_45 = arith.constant 1.42141378 : f32
    %99 = vector.broadcast %cst_45 : f32 to vector<9x128xf32>
    %100 = arith.addf %98, %99 : vector<9x128xf32>
    %101 = arith.mulf %100, %93 : vector<9x128xf32>
    %cst_46 = arith.constant -0.284496725 : f32
    %102 = vector.broadcast %cst_46 : f32 to vector<9x128xf32>
    %103 = arith.addf %101, %102 : vector<9x128xf32>
    %104 = arith.mulf %103, %93 : vector<9x128xf32>
    %cst_47 = arith.constant 0.254829586 : f32
    %105 = vector.broadcast %cst_47 : f32 to vector<9x128xf32>
    %106 = arith.addf %104, %105 : vector<9x128xf32>
    %107 = arith.mulf %106, %93 : vector<9x128xf32>
    %cst_48 = arith.constant 0.000000e+00 : f32
    %108 = vector.broadcast %cst_48 : f32 to vector<9x128xf32>
    %109 = arith.subf %108, %87 : vector<9x128xf32>
    %110 = arith.mulf %109, %87 : vector<9x128xf32>
    %111 = math.exp %110 : vector<9x128xf32>
    %112 = arith.mulf %107, %111 : vector<9x128xf32>
    %cst_49 = arith.constant 1.000000e+00 : f32
    %113 = vector.broadcast %cst_49 : f32 to vector<9x128xf32>
    %114 = arith.subf %113, %112 : vector<9x128xf32>
    %115 = arith.mulf %86, %114 : vector<9x128xf32>
    %cst_50 = arith.constant 1.000000e+00 : f32
    %116 = vector.broadcast %cst_50 : f32 to vector<9x128xf32>
    %117 = arith.addf %116, %115 : vector<9x128xf32>
    %118 = arith.mulf %79, %117 : vector<9x128xf32>
    %c0_51 = arith.constant 0 : index
    %c0_52 = arith.constant 0 : index
    %119 = vector.load %arg10[%c0_51, %c0_52] : memref<128x32xf32, #tpu.memory_space<vmem>>, vector<128x32xf32>
    %cst_53 = arith.constant dense<0.000000e+00> : vector<9x32xf32>
    %120 = tpu.matmul %118, %119, %cst_53 {dimension_numbers = #tpu.dot_dimension_numbers<[1], [0], [0], [1], [0, 0, 1, 1], [], []>} : vector<9x128xf32>, vector<128x32xf32>, vector<9x32xf32> -> vector<9x32xf32>
    %c0_54 = arith.constant 0 : index
    %c0_55 = arith.constant 0 : index
    %121 = vector.load %arg11[%c0_54, %c0_55] : memref<1x32xf32, #tpu.memory_space<vmem>>, vector<1x32xf32>
    %122 = vector.broadcast %121 : vector<1x32xf32> to vector<9x32xf32>
    %123 = arith.addf %120, %122 : vector<9x32xf32>
    %124 = arith.addf %72, %123 : vector<9x32xf32>
    %c0_56 = arith.constant 0 : index
    %c0_57 = arith.constant 0 : index
    %125 = vector.load %arg12[%c0_56, %c0_57] : memref<1x32xf32, #tpu.memory_space<vmem>>, vector<1x32xf32>
    %c0_58 = arith.constant 0 : index
    %c0_59 = arith.constant 0 : index
    %126 = vector.load %arg13[%c0_58, %c0_59] : memref<1x32xf32, #tpu.memory_space<vmem>>, vector<1x32xf32>
    %cst_60 = arith.constant dense<0.000000e+00> : vector<9xf32>
    %127 = vector.multi_reduction <add>, %124, %cst_60 [1] : vector<9x32xf32> to vector<9xf32>
    %128 = vector.shape_cast %127 : vector<9xf32> to vector<9x1xf32>
    %cst_61 = arith.constant 3.200000e+01 : f32
    %129 = vector.broadcast %cst_61 : f32 to vector<9x1xf32>
    %130 = arith.divf %128, %129 : vector<9x1xf32>
    %131 = vector.broadcast %130 : vector<9x1xf32> to vector<9x32xf32>
    %132 = arith.subf %124, %131 : vector<9x32xf32>
    %133 = arith.mulf %132, %132 : vector<9x32xf32>
    %cst_62 = arith.constant dense<0.000000e+00> : vector<9xf32>
    %134 = vector.multi_reduction <add>, %133, %cst_62 [1] : vector<9x32xf32> to vector<9xf32>
    %135 = vector.shape_cast %134 : vector<9xf32> to vector<9x1xf32>
    %cst_63 = arith.constant 3.200000e+01 : f32
    %136 = vector.broadcast %cst_63 : f32 to vector<9x1xf32>
    %137 = arith.divf %135, %136 : vector<9x1xf32>
    %cst_64 = arith.constant 9.99999974E-6 : f32
    %138 = vector.broadcast %cst_64 : f32 to vector<9x1xf32>
    %139 = arith.addf %137, %138 : vector<9x1xf32>
    %140 = math.rsqrt %139 : vector<9x1xf32>
    %141 = vector.broadcast %140 : vector<9x1xf32> to vector<9x32xf32>
    %142 = arith.mulf %132, %141 : vector<9x32xf32>
    %143 = vector.broadcast %125 : vector<1x32xf32> to vector<9x32xf32>
    %144 = arith.mulf %142, %143 : vector<9x32xf32>
    %145 = vector.broadcast %126 : vector<1x32xf32> to vector<9x32xf32>
    %146 = arith.addf %144, %145 : vector<9x32xf32>
    %c0_65 = arith.constant 0 : index
    %c0_66 = arith.constant 0 : index
    %c0_67 = arith.constant 0 : index
    %147 = vector.load %arg14[%c0_65, %c0_66, %c0_67] : memref<1x9x32xf32, #tpu.memory_space<vmem>>, vector<1x9x32xf32>
    %148 = vector.shape_cast %147 : vector<1x9x32xf32> to vector<9x32xf32>
    %149 = vector.shape_cast %146 : vector<9x32xf32> to vector<1x9x32xf32>
    tpu.vector_store %arg14[%c0_65, %c0_66, %c0_67], %149 {strides = array<i32>} : memref<1x9x32xf32, #tpu.memory_space<vmem>>, vector<1x9x32xf32>,
    return
  }
  func.func @transform_0(%arg0: i32) -> (i32, i32, i32) {
    %c0_i32 = arith.constant 0 : i32
    %c0_i32_0 = arith.constant 0 : i32
    %c0_i32_1 = arith.constant 0 : i32
    return %arg0, %c0_i32, %c0_i32_0 : i32, i32, i32
  }
  func.func @transform_1(%arg0: i32) -> (i32, i32) {
    %c0_i32 = arith.constant 0 : i32
    %c0_i32_0 = arith.constant 0 : i32
    %c0_i32_1 = arith.constant 0 : i32
    return %c0_i32, %c0_i32_0 : i32, i32
  }
  func.func @transform_2(%arg0: i32) -> (i32, i32) {
    %c0_i32 = arith.constant 0 : i32
    %c0_i32_0 = arith.constant 0 : i32
    %c0_i32_1 = arith.constant 0 : i32
    return %c0_i32, %c0_i32_0 : i32, i32
  }
  func.func @transform_3(%arg0: i32) -> (i32, i32) {
    %c0_i32 = arith.constant 0 : i32
    %c0_i32_0 = arith.constant 0 : i32
    %c0_i32_1 = arith.constant 0 : i32
    return %c0_i32, %c0_i32_0 : i32, i32
  }
  func.func @transform_4(%arg0: i32) -> (i32, i32) {
    %c0_i32 = arith.constant 0 : i32
    %c0_i32_0 = arith.constant 0 : i32
    %c0_i32_1 = arith.constant 0 : i32
    return %c0_i32, %c0_i32_0 : i32, i32
  }
  func.func @transform_5(%arg0: i32) -> (i32, i32) {
    %c0_i32 = arith.constant 0 : i32
    %c0_i32_0 = arith.constant 0 : i32
    %c0_i32_1 = arith.constant 0 : i32
    return %c0_i32, %c0_i32_0 : i32, i32
  }
  func.func @transform_6(%arg0: i32) -> (i32, i32) {
    %c0_i32 = arith.constant 0 : i32
    %c0_i32_0 = arith.constant 0 : i32
    %c0_i32_1 = arith.constant 0 : i32
    return %c0_i32, %c0_i32_0 : i32, i32
  }
  func.func @transform_7(%arg0: i32) -> (i32, i32) {
    %c0_i32 = arith.constant 0 : i32
    %c0_i32_0 = arith.constant 0 : i32
    %c0_i32_1 = arith.constant 0 : i32
    return %c0_i32, %c0_i32_0 : i32, i32
  }
  func.func @transform_8(%arg0: i32) -> (i32, i32) {
    %c0_i32 = arith.constant 0 : i32
    %c0_i32_0 = arith.constant 0 : i32
    %c0_i32_1 = arith.constant 0 : i32
    return %c0_i32, %c0_i32_0 : i32, i32
  }
  func.func @transform_9(%arg0: i32) -> (i32, i32) {
    %c0_i32 = arith.constant 0 : i32
    %c0_i32_0 = arith.constant 0 : i32
    %c0_i32_1 = arith.constant 0 : i32
    return %c0_i32, %c0_i32_0 : i32, i32
  }
  func.func @transform_10(%arg0: i32) -> (i32, i32) {
    %c0_i32 = arith.constant 0 : i32
    %c0_i32_0 = arith.constant 0 : i32
    %c0_i32_1 = arith.constant 0 : i32
    return %c0_i32, %c0_i32_0 : i32, i32
  }
  func.func @transform_11(%arg0: i32) -> (i32, i32) {
    %c0_i32 = arith.constant 0 : i32
    %c0_i32_0 = arith.constant 0 : i32
    %c0_i32_1 = arith.constant 0 : i32
    return %c0_i32, %c0_i32_0 : i32, i32
  }
  func.func @transform_12(%arg0: i32) -> (i32, i32) {
    %c0_i32 = arith.constant 0 : i32
    %c0_i32_0 = arith.constant 0 : i32
    %c0_i32_1 = arith.constant 0 : i32
    return %c0_i32, %c0_i32_0 : i32, i32
  }
  func.func @transform_13(%arg0: i32) -> (i32, i32, i32) {
    %c0_i32 = arith.constant 0 : i32
    %c0_i32_0 = arith.constant 0 : i32
    %c0_i32_1 = arith.constant 0 : i32
    return %arg0, %c0_i32, %c0_i32_0 : i32, i32, i32
  }
}

</mosaic_0001>

<bundles_post_ra>
// kernel: tpu_custom_call.1
= control target key start
LH: loop header
LB: loop body
LE: loop exit
PB: predicated region body
PF: predicated region fallthrough
CT: control target
= control target key end

     0   :  { %s1864_s25 = smov 0   ;;  %s2054_s0 = inlined_call_operand.vmem [shape: f32[2,9,32], index: 0, kind: input, shape index: {}]   ;;  %s2055_s1 = inlined_call_operand.vmem [shape: f32[32,96], index: 1, kind: input, shape index: {}]   ;;  %s2056_s2 = inlined_call_operand.vmem [shape: f32[1,96], index: 2, kind: input, shape index: {}]   ;;  %s2057_s3 = inlined_call_operand.vmem [shape: f32[32,32], index: 3, kind: input, shape index: {}]   ;;  %s2058_s4 = inlined_call_operand.vmem [shape: f32[1,32], index: 4, kind: input, shape index: {}]   ;;  %s2059_s5 = inlined_call_operand.vmem [shape: f32[1,32], index: 5, kind: input, shape index: {}]   ;;  %s2060_s6 = inlined_call_operand.vmem [shape: f32[1,32], index: 6, kind: input, shape index: {}]   ;;  %s2061_s7 = inlined_call_operand.vmem [shape: f32[32,128], index: 7, kind: input, shape index: {}]   ;;  %s2062_s8 = inlined_call_operand.vmem [shape: f32[1,128], index: 8, kind: input, shape index: {}]   ;;  %s2063_s9 = inlined_call_operand.vmem [shape: f32[128,32], index: 9, kind: input, shape index: {}]   ;;  %s2064_s10 = inlined_call_operand.vmem [shape: f32[1,32], index: 10, kind: input, shape index: {}]   ;;  %s2065_s11 = inlined_call_operand.vmem [shape: f32[1,32], index: 11, kind: input, shape index: {}]   ;;  %s2066_s12 = inlined_call_operand.vmem [shape: f32[1,32], index: 12, kind: input, shape index: {}]   ;;  %s2067_s13 = inlined_call_operand.vmem [shape: f32[2,9,32], index: 13, kind: output, shape index: {}]  }
   0x1 LB: > { %s1441_s26 = sadd.s32 4294967295, %s1784_s25   ;;  %p1445_p0 = scmp.ge.s32.totalorder %s1784_s25, 1  ;;  %s1784_s25 = sphi %s1864_s25, %s23_s25  }
   0x2   : > { %p387_p1 = scmp.lt.s32.totalorder %s1784_s25, 3 }
   0x4   : > { %p388_p2 = pnand %p1445_p0, %p387_p1 }
   0x5   : > { %v443_v0 = vld [vmem:[%s2055_s1] sm:$0xff] (!%p388_p2)  ;;  %v444_v1 = vld [vmem:[%s2055_s1 + $0x8] sm:$0xff] (!%p388_p2)  ;;  %v445_v2 = vld [vmem:[%s2055_s1 + $0x10] sm:$0xff] (!%p388_p2)  ;;  %p431_p3 = scmp.lt.s32.totalorder (!%p388_p2), %s1441_s26, 1  ;;  %vm454_vm0 = vcmask (!%p388_p2), 261120   ;;  %vm542_vm1 = vcmask (!%p388_p2), 130048  }
   0x6   : > { %391 = sbr.rel (%p388_p2) target bundleno = 2564 (0xa04), region = 72  ;;  %v1630_v3 = vpack.c.bf16 (!%p388_p2), %v444_v1, %v443_v0  ;;  %v446_v4 = vld [vmem:[%s2055_s1 + $0x18] sm:$0xff] (!%p388_p2)  ;;  %v1450_v8 = vld [vmem:[%s2056_s2] ss:$0 sm:$0xff] (!%p388_p2)  ;;  %s1786_s24 = smov (!%p388_p2), 112   ;;  %vm1639_vm2 = vmpackc.low (!%p388_p2), %vm542_vm1, %vm542_vm1  ;;  %vm632_vm3 = vcmask (!%p388_p2), 65536  }
   0x7   : > { %v1634_v5 = vpack.c.bf16 (!%p388_p2), %v446_v4, %v445_v2  ;;  %s1787_s27 = smov (!%p388_p2), 96   ;;  %s1788_s28 = smov (!%p388_p2), 80   ;;  %vm628_vm4 = vcmask (!%p388_p2), 72704   ;;  %vm663_vm5 = vcmask (!%p388_p2), 1040384   ;;  %vm1791_vm6 = vmmov (!%p388_p2), 1  }
   0x8   : > { %1631 = vmatprep.subr.bf16.mxu1 (!%p388_p2), %v1630_v3  ;;  %s1789_s29 = smov (!%p388_p2), 64   ;;  %s1790_s30 = smov (!%p388_p2), 48   ;;  %vm1645_vm7 = vmpackc.low (!%p388_p2), %vm663_vm5, %vm1791_vm6  ;;  %vm1053_vm8 = vcmask (!%p388_p2), 253952  }
   0x9   : > { %1633 = vmatpush3.bf16.msra.mxu1 (!%p388_p2), %v1630_v3  ;;  %s1792_s23 = smov (!%p388_p2), 16  }
   0xa   : > { %1635 = vmatprep.subr.bf16.mxu1 (!%p388_p2), %v1634_v5 }
   0xd   : > { %s2069_s26 = smov (!%p431_p3, %s1441_s26), 1  ;;  %1637 = vmatpush3.bf16.msra.mxu1 %v1634_v5 }
   0xe   : > { %s1480_s18 = sshll.u32 %s2069_s26, 4 }
   0xf   : > { %s435_s21 = scalar_lea.vmem %s2054_s0, %s1480_s18 }
  0x10   : > { %v1892_v6 = vld [vmem:[%s435_s21] sm:$0xff]  ;;  %v1896_v7 = vld [vmem:[%s435_s21 + $0x8] sm:$0x1] }
  0x11   : > { %1542 = vmatprep.mubr.msk.f32.mxu1 %vm454_vm0, %v1892_v6 }
  0x12   : > { %1543 = vmatmul.mubr.msk.f32.vlgmr.msra.gmra.mrb[0].mxu1 %vm454_vm0, %v1896_v7 }
  0xe5   : > { %v1544_v9 = vpop.f32.mrb[0].mxu1 }
  0xe6   : > { %v533_v10 = vadd.f32 %v1544_v9, %v1450_v8  ;;  %v527_v11 = vpop.f32.mrb[1].mxu1 }
  0xe7   : > { %v528_v12 = vadd.f32 %v1450_v8, %v527_v11 }
  0xe9   : > { %741 = vrot.lane.b32.xlu1 %v528_v12, %s1786_s24  ;;  %1549 = vmatprep.mubr.msk.f32.mxu1 %vm542_vm1, %v528_v12  ;;  %v1904_v13 = vpack.i.bf16 %v533_v10, %v528_v12 }
  0xeb   : > { %1727 = vrot.lane.b32.xlu0 %v1904_v13, %s1787_s27 }
  0xed   : > { %743 = vrot.lane.b32.xlu1 %v533_v10, %s1786_s24  ;;  %s440_s24 = scalar_lea.vmem %s2067_s13, %s1480_s18 }
  0xef   : > { %1732 = vrot.lane.b32.xlu0 %v1904_v13, %s1788_s28 }
 0x15b   : > { %v742_v22 = vpop.permute.xlu1 %741 }
 0x15d   : > { %v1728_v14 = vpop.permute.xlu0 %1727 }
 0x15e   : > { %v1730_v15 = vunpack.i.h.bf16 %v1728_v14  ;;  %v1729_v16 = vunpack.i.l.bf16 %v1728_v14  ;;  %v954_v14 = vld [vmem:[%s2057_s3] sm:$0xff] }
 0x15f   : > { %v744_v23 = vpop.permute.xlu1 %743 }
 0x160   : > { %v1638_v17 = vpack.c.bf16 %v1730_v15, %v1729_v16  ;;  %v955_v15 = vld [vmem:[%s2057_s3 + $0x8] sm:$0xff] }
 0x161   : > { %v1733_v18 = vpop.permute.xlu0 %1732  ;;  %v1662_v16 = vpack.c.bf16 %v955_v15, %v954_v14  ;;  %v1246_v14 = vld [vmem:[%s2063_s9 + $0x30] sm:$0xff]  ;;  %v1247_v15 = vld [vmem:[%s2063_s9 + $0x38] sm:$0xff] }
 0x162   : > { %v1735_v19 = vunpack.i.h.bf16 %v1733_v18  ;;  %v1734_v20 = vunpack.i.l.bf16 %v1733_v18  ;;  %1640 = vmatprep.subr.msk.bf16.mxu1 %vm1639_vm2, %v1638_v17  ;;  %v957_v18 = vld [vmem:[%s2057_s3 + $0x18] sm:$0xff] }
 0x163   : > { %1643 = vmatpush3.bf16.xpose.msk.msra.mxu1 %vm1639_vm2, %v1638_v17  ;;  %v956_v17 = vld [vmem:[%s2057_s3 + $0x10] sm:$0xff] }
 0x164   : > { %v1650_v21 = vpack.c.bf16 %v1735_v19, %v1734_v20  ;;  %v1666_v19 = vpack.c.bf16 %v957_v18, %v956_v17  ;;  %v1248_v17 = vld [vmem:[%s2063_s9 + $0x40] sm:$0xff]  ;;  %v1249_v18 = vld [vmem:[%s2063_s9 + $0x48] sm:$0xff] }
 0x166   : > { %1652 = vmatprep.subr.msk.bf16.mxu1 %vm1639_vm2, %v1650_v21 }
 0x16a   : > { %1550 = vmatmul.mubr.msk.f32.vlgmr.msra.gmra.mrb[2].mxu1 %vm542_vm1, %v533_v10 }
 0x16b   : > { %1655 = vmatpush3.bf16.xpose.msk.msra.mxu1 %vm1639_vm2, %v1650_v21  ;;  %1563 = vmatprep.mubr.msk.f32.mxu1 %vm542_vm1, %v742_v22 }
 0x16c   : > { %1663 = vmatprep.subr.bf16.mxu1 %v1662_v16 }
 0x172   : > { %1564 = vmatmul.mubr.msk.f32.vlgmr.msra.gmra.mrb[4].mxu1 %vm542_vm1, %v744_v23 }
 0x173   : > { %1665 = vmatpush3.bf16.msra.mxu1 %v1662_v16  ;;  %v1690_v16 = vpack.c.bf16 %v1247_v15, %v1246_v14 }
 0x174   : > { %1667 = vmatprep.subr.bf16.mxu1 %v1666_v19 }
 0x177   : > { %1669 = vmatpush3.bf16.msra.mxu1 %v1666_v19  ;;  %v1694_v19 = vpack.c.bf16 %v1249_v18, %v1248_v17 }
 0x23d   : > { %v1551_v24 = vpop.f32.mrb[2].mxu1 }
 0x23e   : > { %v627_v25 = vmul.f32 0.25, %v1551_v24  ;;  %v617_v26 = vpop.f32.mrb[3].mxu1 }
 0x23f   : > { %v626_v27 = vmul.f32 0.25, %v617_v26 }
 0x240   : > { %v633_v28 = vsel %vm632_vm3, %v627_v25, -inf }
 0x241   : > { %634 = vmax.xlane.f32.xlu1 %v633_v28  ;;  %v629_v29 = vsel %vm628_vm4, %v626_v27, -inf  ;;  %v1467_v28 = vld [vmem:[%s2058_s4] ss:$0 sm:$0xff] }
 0x242   : > { %630 = vmax.xlane.f32.xlu0 %v629_v29 }
 0x245   : > { %v1565_v30 = vpop.f32.mrb[4].mxu1 }
 0x246   : > { %v823_v31 = vpop.f32.mrb[5].mxu1  ;;  %v833_v33 = vmul.f32 0.25, %v1565_v30 }
 0x247   : > { %v832_v32 = vmul.f32 0.25, %v823_v31 }
 0x248   : > { %v837_v35 = vsel %vm632_vm3, %v833_v33, -inf }
 0x249   : > { %v834_v34 = vsel %vm628_vm4, %v832_v32, -inf }
 0x24a   : > { %835 = vmax.xlane.f32.xlu0 %v834_v34 }
 0x24e   : > { %838 = vmax.xlane.f32.xlu0 %v837_v35 }
 0x2ce   : > { %v635_v36 = vpop.xlane.xlu1 %634 }
 0x2cf   : > { %v637_v37 = vsub.f32 %v627_v25, %v635_v36  ;;  %v631_v38 = vpop.xlane.xlu0 %630 }
 0x2d0   : > { %v636_v39 = vsub.f32 %v626_v27, %v631_v38 }
 0x2d1   : > { %v640_v40 = vmul.f32 1.442695, %v637_v37 }
 0x2d2   : > { %v638_v41 = vmul.f32 1.442695, %v636_v39 }
 0x2d3   : > { %1746 = vpow2.f32 %v640_v40 }
 0x2d4   : > { %1748 = vpow2.f32 %v638_v41 }
 0x2d7   : > { %v836_v42 = vpop.xlane.xlu0 %835 }
 0x2d8   : > { %v840_v43 = vsub.f32 %v832_v32, %v836_v42 }
 0x2da   : > { %v842_v44 = vmul.f32 1.442695, %v840_v43 }
 0x2db   : > { %v839_v45 = vpop.xlane.xlu0 %838 }
 0x2dc   : > { %1750 = vpow2.f32 %v842_v44  ;;  %v841_v46 = vsub.f32 %v833_v33, %v839_v45 }
 0x2dd   : > { %v1747_v47 = vpop.eup %1746 }
 0x2de   : > { %v1749_v48 = vpop.eup %1748  ;;  %v844_v49 = vmul.f32 1.442695, %v841_v46  ;;  %v645_v50 = vsel %vm632_vm3, %v1747_v47, 0.0  ;;  %v1095_v46 = vld [vmem:[%s2061_s7 + $0x8] sm:$0xff] }
 0x2df   : > { %646 = vadd.xlane.f32.xlu0 %v645_v50  ;;  %v642_v51 = vsel %vm628_vm4, %v1749_v48, 0.0 }
 0x2e0   : > { %1752 = vpow2.f32 %v844_v49  ;;  %643 = vadd.xlane.f32.xlu1 %v642_v51  ;;  %v1097_v49 = vld [vmem:[%s2061_s7 + $0x18] sm:$0xff] }
 0x2e6   : > { %v1751_v52 = vpop.eup %1750 }
 0x2e7   : > { %v846_v53 = vsel %vm628_vm4, %v1751_v52, 0.0 }
 0x2e8   : > { %847 = vadd.xlane.f32.xlu1 %v846_v53 }
 0x2ea   : > { %v1753_v54 = vpop.eup %1752 }
 0x2eb   : > { %v849_v55 = vsel %vm632_vm3, %v1753_v54, 0.0 }
 0x2ec   : > { %850 = vadd.xlane.f32.xlu0 %v849_v55 }
 0x2f9   : > { %1737 = vrot.lane.b32.xlu1 %v1904_v13, %s1789_s29 }
 0x302   : > { %1742 = vrot.lane.b32.xlu0 %v1904_v13, %s1790_s30 }
 0x36c   : > { %v647_v57 = vpop.xlane.xlu0 %646 }
 0x36d   : > { %v644_v56 = vpop.xlane.xlu1 %643 }
 0x36e   : > { %1754 = vrcp.f32 %v644_v56 }
 0x36f   : > { %1756 = vrcp.f32 %v647_v57 }
 0x375   : > { %v848_v58 = vpop.xlane.xlu1 %847 }
 0x376   : > { %1758 = vrcp.f32 %v848_v58  ;;  %v1470_v58 = vld [vmem:[%s2059_s5] ss:$0 sm:$0xff] }
 0x378   : > { %v1755_v59 = vpop.eup %1754 }
 0x379   : > { %v1738_v60 = vpop.permute.xlu1 %1737  ;;  %v851_v61 = vpop.xlane.xlu0 %850  ;;  %v649_v62 = vmul.f32 %v1755_v59, %v1749_v48  ;;  %v1096_v48 = vld [vmem:[%s2061_s7 + $0x10] sm:$0xff] }
 0x37a   : > { %v1740_v63 = vunpack.i.h.bf16 %v1738_v60  ;;  %v1739_v0 = vunpack.i.l.bf16 %v1738_v60  ;;  %1760 = vrcp.f32 %v851_v61  ;;  %v1757_v2 = vpop.eup %1756  ;;  %v1674_v50 = vpack.c.bf16 %v1097_v49, %v1096_v48  ;;  %v1471_v60 = vld [vmem:[%s2060_s6] ss:$0 sm:$0xff] }
 0x37b   : > { %1556 = vmatprep.mubr.msk.f32.mxu0 %vm628_vm4, %v649_v62  ;;  %v651_v10 = vmul.f32 %v1757_v2, %v1747_v47 }
 0x37c   : > { %v1644_v1 = vpack.c.bf16 %v1740_v63, %v1739_v0 }
 0x37d   : > { %v1743_v3 = vpop.permute.xlu0 %1742 }
 0x37e   : > { %v1745_v4 = vunpack.i.h.bf16 %v1743_v3  ;;  %v1744_v5 = vunpack.i.l.bf16 %v1743_v3  ;;  %1646 = vmatprep.subr.msk.bf16.mxu0 %vm1645_vm7, %v1644_v1  ;;  %v1240_v3 = vld [vmem:[%s2063_s9] sm:$0xff] }
 0x37f   : > { %1649 = vmatpush3.bf16.msk.msra.mxu0 %vm1645_vm7, %v1644_v1 }
 0x380   : > { %v1759_v8 = vpop.eup %1758  ;;  %v1656_v9 = vpack.c.bf16 %v1745_v4, %v1744_v5  ;;  %v1241_v4 = vld [vmem:[%s2063_s9 + $0x8] sm:$0xff] }
 0x381   : > { %v853_v11 = vmul.f32 %v1759_v8, %v1751_v52  ;;  %v1678_v5 = vpack.c.bf16 %v1241_v4, %v1240_v3  ;;  %v1242_v8 = vld [vmem:[%s2063_s9 + $0x10] sm:$0xff] }
 0x382   : > { %1557 = vmatmul.mubr.msk.f32.vlgmr.msra.gmra.mrb[0].mxu0 %vm628_vm4, %v651_v10  ;;  %1658 = vmatprep.subr.msk.bf16.mxu0 %vm1645_vm7, %v1656_v9 }
 0x383   : > { %1661 = vmatpush3.bf16.msk.msra.mxu0 %vm1645_vm7, %v1656_v9  ;;  %1570 = vmatprep.mubr.msk.f32.mxu0 %vm628_vm4, %v853_v11  ;;  %v1243_v9 = vld [vmem:[%s2063_s9 + $0x18] sm:$0xff]  ;;  %v1244_v11 = vld [vmem:[%s2063_s9 + $0x20] sm:$0xff] }
 0x384   : > { %v1761_v12 = vpop.eup %1760  ;;  %1679 = vmatprep.subr.bf16.mxu0 %v1678_v5  ;;  %v1682_v10 = vpack.c.bf16 %v1243_v9, %v1242_v8 }
 0x385   : > { %v855_v13 = vmul.f32 %v1761_v12, %v1753_v54  ;;  %v1245_v12 = vld [vmem:[%s2063_s9 + $0x28] sm:$0xff] }
 0x387   : > { %1571 = vmatmul.mubr.msk.f32.vlgmr.msra.gmra.mrb[2].mxu0 %vm628_vm4, %v855_v13  ;;  %v1686_v13 = vpack.c.bf16 %v1245_v12, %v1244_v11  ;;  %v1793_v11 = vmov -1.0  }
 0x388   : > { %1681 = vmatpush3.bf16.msra.mxu0 %v1678_v5 }
 0x389   : > { %1683 = vmatprep.subr.bf16.mxu0 %v1682_v10 }
 0x38c   : > { %1685 = vmatpush3.bf16.msra.mxu0 %v1682_v10 }
 0x38d   : > { %1687 = vmatprep.subr.bf16.mxu0 %v1686_v13 }
 0x390   : > { %1689 = vmatpush3.bf16.msra.mxu0 %v1686_v13 }
 0x391   : > { %1691 = vmatprep.subr.bf16.mxu0 %v1690_v16 }
 0x394   : > { %1693 = vmatpush3.bf16.msra.mxu0 %v1690_v16 }
 0x395   : > { %1695 = vmatprep.subr.bf16.mxu0 %v1694_v19 }
 0x398   : > { %1697 = vmatpush3.bf16.msra.mxu0 %v1694_v19 }
 0x455   : > { %v1558_v20 = vpop.f32.mrb[0].mxu0 }
 0x456   : > { %v732_v21 = vpop.f32.mrb[1].mxu0 }
 0x45a   : > { %v1572_v22 = vpop.f32.mrb[2].mxu0 }
 0x45b   : > { %v935_v23 = vpop.f32.mrb[3].mxu0 }
 0x45c   : > { %946 = vrot.lane.b32.xlu1 %v935_v23, %s1792_s23  ;;  %v1252_v23 = vld [vmem:[%s2063_s9 + $0x60] sm:$0xff] }
 0x460   : > { %948 = vrot.lane.b32.xlu1 %v1572_v22, %s1792_s23 }
 0x4ce   : > { %v947_v24 = vpop.permute.xlu1 %946 }
 0x4cf   : > { %v952_v25 = vsel %vm542_vm1, %v732_v21, %v947_v24  ;;  %v1251_v21 = vld [vmem:[%s2063_s9 + $0x58] sm:$0xff]  ;;  %v1253_v24 = vld [vmem:[%s2063_s9 + $0x68] sm:$0xff] }
 0x4d0   : > { %1581 = vmatprep.mubr.msk.f32.mxu1 %vm454_vm0, %v952_v25  ;;  %v1702_v25 = vpack.c.bf16 %v1253_v24, %v1252_v23  ;;  %v1475_v23 = vld [vmem:[%s2064_s10] ss:$0 sm:$0xff] }
 0x4d2   : > { %v949_v26 = vpop.permute.xlu1 %948 }
 0x4d3   : > { %v953_v27 = vsel %vm542_vm1, %v1558_v20, %v949_v26  ;;  %v1250_v20 = vld [vmem:[%s2063_s9 + $0x50] sm:$0xff] }
 0x4d4   : > { %1582 = vmatmul.mubr.msk.f32.vlgmr.msra.gmra.mrb[6].mxu1 %vm454_vm0, %v953_v27  ;;  %v1698_v22 = vpack.c.bf16 %v1251_v21, %v1250_v20  ;;  %v1254_v26 = vld [vmem:[%s2063_s9 + $0x70] sm:$0xff]  ;;  %v1255_v27 = vld [vmem:[%s2063_s9 + $0x78] sm:$0xff] }
 0x4d6   : > { %1699 = vmatprep.subr.bf16.mxu0 %v1698_v22 }
 0x4d7   : > { %1701 = vmatpush3.bf16.msra.mxu0 %v1698_v22 }
 0x4d8   : > { %1703 = vmatprep.subr.bf16.mxu0 %v1702_v25 }
 0x4db   : > { %1705 = vmatpush3.bf16.msra.mxu0 %v1702_v25 }
 0x5a7   : > { %v1583_v29 = vpop.f32.mrb[6].mxu1 }
 0x5a8   : > { %v1043_v30 = vadd.f32 %v1583_v29, %v1467_v28  ;;  %v1037_v31 = vpop.f32.mrb[7].mxu1  ;;  %v1472_v29 = vld [vmem:[%s2062_s8] ss:$0 sm:$0xff] }
 0x5a9   : > { %v1038_v32 = vadd.f32 %v1467_v28, %v1037_v31  ;;  %v1706_v28 = vpack.c.bf16 %v1255_v27, %v1254_v26 }
 0x5aa   : > { %v1047_v33 = vadd.f32 %v1043_v30, %v1896_v7 }
 0x5ab   : > { %v1046_v34 = vadd.f32 %v1038_v32, %v1892_v6  ;;  %v1094_v6 = vld [vmem:[%s2061_s7] sm:$0xff]  ;;  %1707 = vmatprep.subr.bf16.mxu0 %v1706_v28 }
 0x5ac   : > { %v1054_v35 = vsel %vm1053_vm8, %v1047_v33, 0.0  ;;  %v1670_v47 = vpack.c.bf16 %v1095_v46, %v1094_v6  ;;  %1709 = vmatpush3.bf16.msra.mxu0 %v1706_v28 }
 0x5ad   : > { %1055 = vadd.xlane.f32.xlu1 %v1054_v35  ;;  %v1050_v36 = vsel %vm454_vm0, %v1046_v34, 0.0 }
 0x5ae   : > { %1051 = vadd.xlane.f32.xlu0 %v1050_v36  ;;  %1671 = vmatprep.subr.bf16.mxu1 %v1670_v47 }
 0x5af   : > { %1673 = vmatpush3.bf16.msra.mxu1 %v1670_v47 }
 0x5b0   : > { %1675 = vmatprep.subr.bf16.mxu1 %v1674_v50 }
 0x5b3   : > { %1677 = vmatpush3.bf16.msra.mxu1 %v1674_v50 }
 0x63a   : > { %v1056_v37 = vpop.xlane.xlu1 %1055 }
 0x63b   : > { %v1059_v38 = vmul.f32 0.03125, %v1056_v37  ;;  %v1052_v39 = vpop.xlane.xlu0 %1051 }
 0x63c   : > { %v1058_v40 = vmul.f32 0.03125, %v1052_v39 }
 0x63d   : > { %v1061_v41 = vsub.f32 %v1047_v33, %v1059_v38 }
 0x63e   : > { %v1060_v42 = vsub.f32 %v1046_v34, %v1058_v40 }
 0x63f   : > { %v1063_v45 = vmul.f32 %v1061_v41, %v1061_v41 }
 0x640   : > { %v1062_v43 = vmul.f32 %v1060_v42, %v1060_v42 }
 0x641   : > { %v1067_v7 = vsel %vm1053_vm8, %v1063_v45, 0.0 }
 0x642   : > { %v1064_v44 = vsel %vm454_vm0, %v1062_v43, 0.0 }
 0x643   : > { %1065 = vadd.xlane.f32.xlu0 %v1064_v44 }
 0x647   : > { %1068 = vadd.xlane.f32.xlu0 %v1067_v7 }
 0x6d0   : > { %v1066_v51 = vpop.xlane.xlu0 %1065 }
 0x6d1   : > { %v1070_v52 = vmul.f32 0.03125, %v1066_v51 }
 0x6d3   : > { %v1072_v53 = vadd.f32 1e-05, %v1070_v52 }
 0x6d4   : > { %v1069_v54 = vpop.xlane.xlu0 %1068 }
 0x6d5   : > { %1762 = vrsqrt.f32 %v1072_v53  ;;  %v1071_v55 = vmul.f32 0.03125, %v1069_v54 }
 0x6d7   : > { %v1073_v56 = vadd.f32 1e-05, %v1071_v55 }
 0x6d9   : > { %1764 = vrsqrt.f32 %v1073_v56 }
 0x6df   : > { %v1763_v57 = vpop.eup %1762 }
 0x6e0   : > { %v1076_v59 = vmul.f32 %v1763_v57, %v1060_v42 }
 0x6e2   : > { %v1084_v61 = vmul.f32 %v1470_v58, %v1076_v59 }
 0x6e3   : > { %v1765_v62 = vpop.eup %1764 }
 0x6e4   : > { %v1077_v63 = vmul.f32 %v1765_v62, %v1061_v41  ;;  %v1970_v0 = vadd.f32 %v1471_v60, %v1084_v61 }
 0x6e6   : > { %v1085_v1 = vmul.f32 %v1470_v58, %v1077_v63  ;;  %1592 = vmatprep.mubr.msk.f32.mxu1 %vm454_vm0, %v1970_v0 }
 0x6e8   : > { %v1974_v2 = vadd.f32 %v1471_v60, %v1085_v1 }
 0x6ea   : > { %1593 = vmatmul.mubr.msk.f32.vlgmr.msra.gmra.mrb[8].mxu1 %vm454_vm0, %v1974_v2 }
 0x7bd   : > { %v1594_v30 = vpop.f32.mrb[8].mxu1 }
 0x7be   : > { %v1183_v31 = vadd.f32 %v1594_v30, %v1472_v29  ;;  %v1177_v32 = vpop.f32.mrb[9].mxu1 }
 0x7bf   : > { %v1178_v33 = vadd.f32 %v1472_v29, %v1177_v32 }
 0x7c0   : > { %v1189_v34 = vmul.f32 0.70710677, %v1183_v31  ;;  %v1187_v20 = vmul.f32 0.5, %v1183_v31 }
 0x7c1   : > { %v1188_v35 = vmul.f32 0.70710677, %v1178_v33  ;;  %v1186_v18 = vmul.f32 0.5, %v1178_v33 }
 0x7c2   : > { %v1195_v36 = vand.u32 2147483647, %v1189_v34  ;;  %vm1191_vm9 = vcmp.ge.f32.partialorder %v1189_v34, 0.0 }
 0x7c3   : > { %v1194_v37 = vand.u32 2147483647, %v1188_v35  ;;  %vm1190_vm10 = vcmp.ge.f32.partialorder %v1188_v35, 0.0  ;;  %v1193_v12 = vsel %vm1191_vm9, 1.0, %v1793_v11 }
 0x7c4   : > { %v1197_v38 = vmul.f32 0.3275911, %v1195_v36  ;;  %v1223_v42 = vsub.f32 0.0, %v1195_v36  ;;  %v1192_v15 = vsel %vm1190_vm10, 1.0, %v1793_v11 }
 0x7c5   : > { %v1196_v39 = vmul.f32 0.3275911, %v1194_v37  ;;  %v1222_v43 = vsub.f32 0.0, %v1194_v37 }
 0x7c6   : > { %v1199_v40 = vadd.f32 1.0, %v1197_v38  ;;  %v1225_v45 = vmul.f32 %v1223_v42, %v1195_v36 }
 0x7c7   : > { %v1198_v41 = vadd.f32 1.0, %v1196_v39  ;;  %v1224_v46 = vmul.f32 %v1222_v43, %v1194_v37 }
 0x7c8   : > { %1766 = vrcp.f32 %v1199_v40  ;;  %v1228_v49 = vmul.f32 1.442695, %v1225_v45 }
 0x7c9   : > { %1768 = vrcp.f32 %v1198_v41  ;;  %v1226_v52 = vmul.f32 1.442695, %v1224_v46 }
 0x7ca   : > { %1770 = vpow2.f32 %v1228_v49 }
 0x7cb   : > { %1772 = vpow2.f32 %v1226_v52 }
 0x7d2   : > { %v1767_v44 = vpop.eup %1766 }
 0x7d3   : > { %v1769_v7 = vpop.eup %1768  ;;  %v1205_v6 = vmul.f32 1.0614054, %v1767_v44 }
 0x7d4   : > { %v1204_v47 = vmul.f32 1.0614054, %v1769_v7  ;;  %v1771_v3 = vpop.eup %1770 }
 0x7d5   : > { %v1207_v48 = vadd.f32 -1.4531521, %v1205_v6  ;;  %v1773_v5 = vpop.eup %1772  ;;  %v1476_v6 = vld [vmem:[%s2065_s11] ss:$0 sm:$0xff] }
 0x7d6   : > { %v1206_v50 = vadd.f32 -1.4531521, %v1204_v47 }
 0x7d7   : > { %v1209_v51 = vmul.f32 %v1767_v44, %v1207_v48  ;;  %v1477_v48 = vld [vmem:[%s2066_s12] ss:$0 sm:$0xff] }
 0x7d8   : > { %v1208_v53 = vmul.f32 %v1769_v7, %v1206_v50 }
 0x7d9   : > { %v1211_v54 = vadd.f32 1.4214138, %v1209_v51 }
 0x7da   : > { %v1210_v55 = vadd.f32 1.4214138, %v1208_v53 }
 0x7db   : > { %v1213_v56 = vmul.f32 %v1767_v44, %v1211_v54 }
 0x7dc   : > { %v1212_v57 = vmul.f32 %v1769_v7, %v1210_v55 }
 0x7dd   : > { %v1215_v58 = vadd.f32 -0.28449672, %v1213_v56 }
 0x7de   : > { %v1214_v59 = vadd.f32 -0.28449672, %v1212_v57 }
 0x7df   : > { %v1217_v60 = vmul.f32 %v1767_v44, %v1215_v58 }
 0x7e0   : > { %v1216_v61 = vmul.f32 %v1769_v7, %v1214_v59 }
 0x7e1   : > { %v1219_v62 = vadd.f32 0.2548296, %v1217_v60 }
 0x7e2   : > { %v1218_v63 = vadd.f32 0.2548296, %v1216_v61 }
 0x7e3   : > { %v1221_v1 = vmul.f32 %v1767_v44, %v1219_v62 }
 0x7e4   : > { %v1220_v4 = vmul.f32 %v1769_v7, %v1218_v63 }
 0x7e5   : > { %v1231_v8 = vmul.f32 %v1771_v3, %v1221_v1 }
 0x7e6   : > { %v1230_v9 = vmul.f32 %v1773_v5, %v1220_v4 }
 0x7e7   : > { %v1233_v10 = vsub.f32 1.0, %v1231_v8 }
 0x7e8   : > { %v1232_v13 = vsub.f32 1.0, %v1230_v9 }
 0x7e9   : > { %v1235_v14 = vmul.f32 %v1233_v10, %v1193_v12 }
 0x7ea   : > { %v1234_v16 = vmul.f32 %v1232_v13, %v1192_v15 }
 0x7eb   : > { %v1237_v17 = vadd.f32 1.0, %v1235_v14 }
 0x7ec   : > { %v1236_v19 = vadd.f32 1.0, %v1234_v16 }
 0x7ed   : > { %v1239_v22 = vmul.f32 %v1237_v17, %v1187_v20 }
 0x7ee   : > { %v1238_v21 = vmul.f32 %v1236_v19, %v1186_v18 }
 0x7f0   : > { %1627 = vmatprep.mubr.f32.mxu0 %v1238_v21 }
 0x7f1   : > { %1628 = vmatmul.mubr.f32.vlgmr.msra.gmra.mrb[4].mxu0 %v1239_v22 }
 0x8c4   : > { %v1629_v24 = vpop.f32.mrb[4].mxu0 }
 0x8c5   : > { %v1335_v25 = vadd.f32 %v1629_v24, %v1475_v23  ;;  %v1329_v26 = vpop.f32.mrb[5].mxu0 }
 0x8c6   : > { %v1330_v27 = vadd.f32 %v1475_v23, %v1329_v26 }
 0x8c7   : > { %v1339_v28 = vadd.f32 %v1335_v25, %v1974_v2 }
 0x8c8   : > { %v1338_v29 = vadd.f32 %v1330_v27, %v1970_v0 }
 0x8c9   : > { %v1345_v30 = vsel %vm1053_vm8, %v1339_v28, 0.0 }
 0x8ca   : > { %1346 = vadd.xlane.f32.xlu0 %v1345_v30  ;;  %v1342_v31 = vsel %vm454_vm0, %v1338_v29, 0.0 }
 0x8cb   : > { %1343 = vadd.xlane.f32.xlu1 %v1342_v31 }
 0x957   : > { %v1347_v32 = vpop.xlane.xlu0 %1346 }
 0x958   : > { %v1349_v33 = vmul.f32 0.03125, %v1347_v32  ;;  %v1344_v34 = vpop.xlane.xlu1 %1343 }
 0x959   : > { %v1348_v35 = vmul.f32 0.03125, %v1344_v34 }
 0x95a   : > { %v1351_v36 = vsub.f32 %v1339_v28, %v1349_v33 }
 0x95b   : > { %v1350_v37 = vsub.f32 %v1338_v29, %v1348_v35 }
 0x95c   : > { %v1353_v38 = vmul.f32 %v1351_v36, %v1351_v36 }
 0x95d   : > { %v1352_v39 = vmul.f32 %v1350_v37, %v1350_v37 }
 0x95e   : > { %v1357_v40 = vsel %vm1053_vm8, %v1353_v38, 0.0 }
 0x95f   : > { %1358 = vadd.xlane.f32.xlu0 %v1357_v40  ;;  %v1354_v2 = vsel %vm454_vm0, %v1352_v39, 0.0 }
 0x960   : > { %1355 = vadd.xlane.f32.xlu1 %v1354_v2 }
 0x9ec   : > { %v1359_v0 = vpop.xlane.xlu0 %1358 }
 0x9ed   : > { %v1361_v41 = vmul.f32 0.03125, %v1359_v0  ;;  %v1356_v42 = vpop.xlane.xlu1 %1355 }
 0x9ee   : > { %v1360_v43 = vmul.f32 0.03125, %v1356_v42 }
 0x9ef   : > { %v1363_v44 = vadd.f32 1e-05, %v1361_v41 }
 0x9f0   : > { %v1362_v45 = vadd.f32 1e-05, %v1360_v43 }
 0x9f1   : > { %1774 = vrsqrt.f32 %v1363_v44 }
 0x9f2   : > { %1776 = vrsqrt.f32 %v1362_v45 }
 0x9fb   : > { %v1775_v7 = vpop.eup %1774 }
 0x9fc   : > { %v1777_v46 = vpop.eup %1776  ;;  %v1367_v47 = vmul.f32 %v1775_v7, %v1351_v36 }
 0x9fd   : > { %v1366_v49 = vmul.f32 %v1777_v46, %v1350_v37 }
 0x9fe   : > { %v1375_v50 = vmul.f32 %v1476_v6, %v1367_v47 }
 0x9ff   : > { %v1374_v51 = vmul.f32 %v1476_v6, %v1366_v49 }
 0xa00   : > { %v1383_v52 = vadd.f32 %v1477_v48, %v1375_v50 }
 0xa01   : > { %v1382_v53 = vadd.f32 %v1477_v48, %v1374_v51 }
 0xa02   : > { %1385 = vst.msk [vmem:[%s440_s24 + $0x8] sm:$0x1] %vm1053_vm8, %v1383_v52 }
 0xa03   : > { %1384 = vst.msk [vmem:[%s440_s24] sm:$0xff] %vm454_vm0, %v1382_v53 }
 0xa04 PF: > { %s23_s25 = sadd.s32 1, %s1784_s25  }
 0xa05   : > { %p20_p4 = scmp.ge.s32.totalorder %s23_s25, 4  }
 0xa07   :  { %22 = sbr.rel (!%p20_p4) target bundleno = 1 (0x1), region = 102 }

</bundles_post_ra>
